<compile_context>
chip_gen: v7x
topology: tpu7x:2x2x1
jax: 0.10.0
libtpu: 0.0.40
codegen_flags: <defaults>
</compile_context>

<pallas_src>
import functools

import jax
import jax.numpy as jnp
from jax.experimental import pallas as pl
from jax.experimental.pallas import tpu as pltpu

H1 = 256
H2 = 64


def _round_up(x, m):
    return (x + m - 1) // m * m


def _mlp_kernel(x_ref, w1_ref, b1_ref, w2_ref, b2_ref, w3_ref, b3_ref, o_ref,
                *, compute_dtype):
    # Per-tile cast (no extra wrapper-side HBM pass over X) for the MXU path.
    x = x_ref[...]
    if x.dtype != compute_dtype:
        x = x.astype(compute_dtype)

    # Layer 1: (tile_b, S) @ (S, 256) on the MXU, f32 accumulation, bias, ReLU.
    h1 = jnp.dot(x, w1_ref[...], preferred_element_type=jnp.float32)
    h1 = jnp.maximum(h1 + b1_ref[...], 0.0)

    # Layer 2: (tile_b, 256) @ (256, 64) on the MXU, f32 accumulation, bias, ReLU.
    h2 = jnp.dot(h1.astype(w2_ref.dtype), w2_ref[...],
                 preferred_element_type=jnp.float32)
    h2 = jnp.maximum(h2 + b2_ref[...], 0.0)

    # Layer 3 (64 -> 1) off the MXU: VPU multiply + XLU lane reduce.  The
    # resulting sublane->lane relayout into the lane-dense (1, tile_b) output
    # block overlaps with the MXU work (perf review), so it is left as-is.
    v = jnp.sum(h2 * w3_ref[...], axis=-1)                     # (tile_b,)
    o_ref[...] = (v[None, :] + b3_ref[...]).astype(o_ref.dtype)


def value_model_forward(states, params, *, tile_b=512,
                        compute_dtype=jnp.float32):
    """states: [B, state_dim] -> [B, 1] (same dtype as `states`)."""
    B, state_dim = states.shape
    w1, b1, w2, b2, w3, b3 = params
    cdt = jnp.dtype(compute_dtype)

    # --- batch-tile selection ------------------------------------------------
    # * grid = cdiv(B, tile_b): NO wrapper-side padding of X.  The last x
    #   block may contain unspecified rows; their outputs fall in the masked
    #   tail of the partial output block and are never consumed.
    # * Multi-tile grids need a 128-multiple tile (lane-dense output blocks);
    #   a single-tile grid uses full-array-dim blocks (no alignment needed).
    # * v7x megacore: when B >= 256, cap the tile so grid >= 2 and both
    #   TensorCores get work (dimension_semantics=("parallel",)).
    tile_b = max(1, int(tile_b))
    if B >= 256:
        tile_b = min(tile_b, _round_up(pl.cdiv(B, 2), 128))
    if tile_b >= B:
        tile_b = B                        # single tile: full-dim blocks
    else:
        tile_b = _round_up(tile_b, 128)   # multi-tile: 128-aligned blocks
        if tile_b >= B:
            tile_b = B
    grid = (pl.cdiv(B, tile_b),)

    # Resident operands: cast once in the wrapper (~100 KiB -- negligible).
    w1_c = w1.astype(cdt)
    w2_c = w2.astype(cdt)
    b1_r = b1.reshape(1, H1).astype(jnp.float32)
    b2_r = b2.reshape(1, H2).astype(jnp.float32)
    w3_r = w3.reshape(1, H2).astype(jnp.float32)
    b3_r = b3.reshape(1, 1).astype(jnp.float32)

    # Only raise the scoped-VMEM limit if a large state_dim would push the
    # double-buffered resident weights + streamed x tiles past the default
    # limit (16 MiB on v5e, 32 MiB on v6e/v7x).  No tile shrink for VMEM.
    itemsize = jnp.dtype(cdt).itemsize
    resident_bytes = 2 * (state_dim * H1 + H1 * H2) * itemsize
    stream_bytes = 2 * tile_b * state_dim * states.dtype.itemsize
    cp_kwargs = dict(dimension_semantics=("parallel",))
    if resident_bytes + stream_bytes > 12 * 1024 * 1024:
        cp_kwargs["vmem_limit_bytes"] = min(
            2 * (resident_bytes + stream_bytes) + (8 << 20), 100 << 20)

    flops = 2 * B * (state_dim * H1 + H1 * H2 + H2)
    bytes_accessed = int(
        B * state_dim * states.dtype.itemsize          # streamed X (read once)
        + (state_dim * H1 + H1 * H2) * itemsize        # resident W1, W2
        + (H1 + H2 + H2 + 1) * 4                       # biases + w3 row
        + B * states.dtype.itemsize)                   # output row

    # NOTE: pipeline_mode=pl.Buffered(...) tuning on the resident weight specs
    # / streamed x spec is a possible few-percent follow-up; omitted here.
    out_row = pl.pallas_call(
        functools.partial(_mlp_kernel, compute_dtype=cdt),
        out_shape=jax.ShapeDtypeStruct((1, B), states.dtype),
        grid_spec=pltpu.PrefetchScalarGridSpec(
            num_scalar_prefetch=0,
            grid=grid,
            in_specs=[
                pl.BlockSpec((tile_b, state_dim), lambda i: (i, 0)),  # x tile
                pl.BlockSpec((state_dim, H1), lambda i: (0, 0)),      # W1 (resident)
                pl.BlockSpec((1, H1), lambda i: (0, 0)),              # b1
                pl.BlockSpec((H1, H2), lambda i: (0, 0)),             # W2 (resident)
                pl.BlockSpec((1, H2), lambda i: (0, 0)),              # b2
                pl.BlockSpec((1, H2), lambda i: (0, 0)),              # w3 row
                pl.BlockSpec((1, 1), lambda i: (0, 0)),               # b3
            ],
            out_specs=pl.BlockSpec((1, tile_b), lambda i: (0, i)),    # lane-dense
        ),
        compiler_params=pltpu.CompilerParams(**cp_kwargs),
        cost_estimate=pl.CostEstimate(
            flops=flops, transcendentals=0, bytes_accessed=bytes_accessed),
    )(states, w1_c, b1_r, w2_c, b2_r, w3_r, b3_r)

    return out_row[0, :].reshape(B, 1)


def init_params(key, state_dim):
    """Deterministic init mimicking torch.nn.Linear default
    (U[-1/sqrt(fan_in), 1/sqrt(fan_in)]). Weights stored [in, out]."""
    dims = [(state_dim, H1), (H1, H2), (H2, 1)]
    params = []
    for (fan_in, fan_out) in dims:
        key, kw, kb = jax.random.split(key, 3)
        bound = 1.0 / jnp.sqrt(jnp.asarray(fan_in, jnp.float32))
        w = jax.random.uniform(kw, (fan_in, fan_out), jnp.float32, -bound, bound)
        b = jax.random.uniform(kb, (1, fan_out), jnp.float32, -bound, bound)
        params += [w, b]
    return tuple(params)


def value_model_ref(states, params):
    w1, b1, w2, b2, w3, b3 = params
    h1 = jnp.maximum(states @ w1 + b1, 0.0)
    h2 = jnp.maximum(h1 @ w2 + b2, 0.0)
    return h2 @ w3 + b3


if __name__ == "__main__":
    key = jax.random.PRNGKey(0)
    state_dim = 32

    k_params, k_x1, k_x2, k_x3 = jax.random.split(key, 4)
    params = init_params(k_params, state_dim)

    # 1) Small smoke test (single tile, batch=8).
    states_small = jax.random.normal(k_x1, (8, state_dim), jnp.float32)
    out_small = jax.block_until_ready(value_model_forward(states_small, params))
    ref_small = value_model_ref(states_small, params)
    assert out_small.shape == (8, 1), out_small.shape
    assert jnp.allclose(out_small, ref_small, atol=1e-5, rtol=1e-5), \
        "mismatch vs pure-JAX reference (small batch)"

    # 2) Ragged multi-tile path: B=200, tile_b=128 -> grid=(2,), no wrapper
    #    padding; last x block has 72 valid rows and the output tail block is
    #    a masked store (rows >= B are never produced/consumed).
    states_rag = jax.random.normal(k_x2, (200, state_dim), jnp.float32)
    out_rag = jax.block_until_ready(
        value_model_forward(states_rag, params, tile_b=128))
    ref_rag = value_model_ref(states_rag, params)
    assert out_rag.shape == (200, 1), out_rag.shape
    assert jnp.allclose(out_rag, ref_rag, atol=1e-5, rtol=1e-5), \
        "mismatch vs pure-JAX reference (ragged multi-tile batch)"

    # 3) Default tile with B>=256: megacore cap forces tile_b=256 -> grid=(2,)
    #    ("parallel" axis keeps both v7x TensorCores busy), ragged last block.
    states_mid = jax.random.normal(k_x3, (300, state_dim), jnp.float32)
    out_mid = jax.block_until_ready(value_model_forward(states_mid, params))
    ref_mid = value_model_ref(states_mid, params)
    assert out_mid.shape == (300, 1), out_mid.shape
    assert jnp.allclose(out_mid, ref_mid, atol=1e-5, rtol=1e-5), \
        "mismatch vs pure-JAX reference (default tile, B>=256)"

    # 4) bf16 streaming path (recommended on v5e/v6e/v7x for HBM-bound X);
    #    per-tile cast in-kernel, f32 accumulation -> loose tolerance only.
    out_bf16 = jax.block_until_ready(
        value_model_forward(states_rag, params, tile_b=128,
                            compute_dtype=jnp.bfloat16))
    assert out_bf16.shape == (200, 1), out_bf16.shape
    assert jnp.allclose(out_bf16, ref_rag, atol=1e-1, rtol=1e-1), \
        "mismatch vs pure-JAX reference (bf16 compute path)"

    print("KERNEL_OK")
</pallas_src>

<mosaic_0001>
module attributes {stable_mosaic.version = 11 : i64} {
  func.func @_mlp_kernel(%arg0: i32, %arg1: memref<8x32xf32, #tpu.memory_space<vmem>>, %arg2: memref<32x256xf32, #tpu.memory_space<vmem>>, %arg3: memref<1x256xf32, #tpu.memory_space<vmem>>, %arg4: memref<256x64xf32, #tpu.memory_space<vmem>>, %arg5: memref<1x64xf32, #tpu.memory_space<vmem>>, %arg6: memref<1x64xf32, #tpu.memory_space<vmem>>, %arg7: memref<1x1xf32, #tpu.memory_space<vmem>>, %arg8: memref<1x8xf32, #tpu.memory_space<vmem>>) attributes {dimension_semantics = [#tpu.dimension_semantics<parallel>], iteration_bounds = array<i64: 1>, scalar_prefetch = 0 : i64, scratch_operands = 0 : i64, tpu.core_type = #tpu.core_type<tc>, window_params = [{transform_indices = @transform_0, window_bounds = array<i64: 8, 32>}, {pipeline_mode = #tpu.pipeline_mode<synchronous>, transform_indices = @transform_1, window_bounds = array<i64: 32, 256>}, {pipeline_mode = #tpu.pipeline_mode<synchronous>, transform_indices = @transform_2, window_bounds = array<i64: 1, 256>}, {pipeline_mode = #tpu.pipeline_mode<synchronous>, transform_indices = @transform_3, window_bounds = array<i64: 256, 64>}, {pipeline_mode = #tpu.pipeline_mode<synchronous>, transform_indices = @transform_4, window_bounds = array<i64: 1, 64>}, {pipeline_mode = #tpu.pipeline_mode<synchronous>, transform_indices = @transform_5, window_bounds = array<i64: 1, 64>}, {pipeline_mode = #tpu.pipeline_mode<synchronous>, transform_indices = @transform_6, window_bounds = array<i64: 1, 1>}, {transform_indices = @transform_7, window_bounds = array<i64: 1, 8>}]} {
    %c0 = arith.constant 0 : index
    %c0_0 = arith.constant 0 : index
    %0 = vector.load %arg1[%c0, %c0_0] : memref<8x32xf32, #tpu.memory_space<vmem>>, vector<8x32xf32>
    %c0_1 = arith.constant 0 : index
    %c0_2 = arith.constant 0 : index
    %1 = vector.load %arg2[%c0_1, %c0_2] : memref<32x256xf32, #tpu.memory_space<vmem>>, vector<32x256xf32>
    %cst = arith.constant dense<0.000000e+00> : vector<8x256xf32>
    %2 = tpu.matmul %0, %1, %cst {dimension_numbers = #tpu.dot_dimension_numbers<[1], [0], [0], [1], [0, 0, 1, 1], [], []>} : vector<8x32xf32>, vector<32x256xf32>, vector<8x256xf32> -> vector<8x256xf32>
    %c0_3 = arith.constant 0 : index
    %c0_4 = arith.constant 0 : index
    %3 = vector.load %arg3[%c0_3, %c0_4] : memref<1x256xf32, #tpu.memory_space<vmem>>, vector<1x256xf32>
    %4 = vector.broadcast %3 : vector<1x256xf32> to vector<8x256xf32>
    %5 = arith.addf %2, %4 : vector<8x256xf32>
    %cst_5 = arith.constant 0.000000e+00 : f32
    %6 = vector.broadcast %cst_5 : f32 to vector<8x256xf32>
    %7 = arith.maximumf %5, %6 : vector<8x256xf32>
    %c0_6 = arith.constant 0 : index
    %c0_7 = arith.constant 0 : index
    %8 = vector.load %arg4[%c0_6, %c0_7] : memref<256x64xf32, #tpu.memory_space<vmem>>, vector<256x64xf32>
    %cst_8 = arith.constant dense<0.000000e+00> : vector<8x64xf32>
    %9 = tpu.matmul %7, %8, %cst_8 {dimension_numbers = #tpu.dot_dimension_numbers<[1], [0], [0], [1], [0, 0, 1, 1], [], []>} : vector<8x256xf32>, vector<256x64xf32>, vector<8x64xf32> -> vector<8x64xf32>
    %c0_9 = arith.constant 0 : index
    %c0_10 = arith.constant 0 : index
    %10 = vector.load %arg5[%c0_9, %c0_10] : memref<1x64xf32, #tpu.memory_space<vmem>>, vector<1x64xf32>
    %11 = vector.broadcast %10 : vector<1x64xf32> to vector<8x64xf32>
    %12 = arith.addf %9, %11 : vector<8x64xf32>
    %cst_11 = arith.constant 0.000000e+00 : f32
    %13 = vector.broadcast %cst_11 : f32 to vector<8x64xf32>
    %14 = arith.maximumf %12, %13 : vector<8x64xf32>
    %c0_12 = arith.constant 0 : index
    %c0_13 = arith.constant 0 : index
    %15 = vector.load %arg6[%c0_12, %c0_13] : memref<1x64xf32, #tpu.memory_space<vmem>>, vector<1x64xf32>
    %16 = vector.broadcast %15 : vector<1x64xf32> to vector<8x64xf32>
    %17 = arith.mulf %14, %16 : vector<8x64xf32>
    %cst_14 = arith.constant dense<0.000000e+00> : vector<8xf32>
    %18 = vector.multi_reduction <add>, %17, %cst_14 [1] : vector<8x64xf32> to vector<8xf32>
    %19 = vector.shape_cast %18 : vector<8xf32> to vector<1x8xf32>
    %c0_15 = arith.constant 0 : index
    %c0_16 = arith.constant 0 : index
    %20 = vector.load %arg7[%c0_15, %c0_16] : memref<1x1xf32, #tpu.memory_space<vmem>>, vector<1x1xf32>
    %21 = vector.broadcast %20 : vector<1x1xf32> to vector<1x8xf32>
    %22 = arith.addf %19, %21 : vector<1x8xf32>
    %c0_17 = arith.constant 0 : index
    %c0_18 = arith.constant 0 : index
    %23 = vector.load %arg8[%c0_17, %c0_18] : memref<1x8xf32, #tpu.memory_space<vmem>>, vector<1x8xf32>
    tpu.vector_store %arg8[%c0_17, %c0_18], %22 {strides = array<i32>} : memref<1x8xf32, #tpu.memory_space<vmem>>, vector<1x8xf32>,
    return
  }
  func.func @transform_0(%arg0: i32) -> (i32, i32) {
    %c0_i32 = arith.constant 0 : i32
    %c0_i32_0 = arith.constant 0 : i32
    return %arg0, %c0_i32 : i32, i32
  }
  func.func @transform_1(%arg0: i32) -> (i32, i32) {
    %c0_i32 = arith.constant 0 : i32
    %c0_i32_0 = arith.constant 0 : i32
    %c0_i32_1 = arith.constant 0 : i32
    return %c0_i32, %c0_i32_0 : i32, i32
  }
  func.func @transform_2(%arg0: i32) -> (i32, i32) {
    %c0_i32 = arith.constant 0 : i32
    %c0_i32_0 = arith.constant 0 : i32
    %c0_i32_1 = arith.constant 0 : i32
    return %c0_i32, %c0_i32_0 : i32, i32
  }
  func.func @transform_3(%arg0: i32) -> (i32, i32) {
    %c0_i32 = arith.constant 0 : i32
    %c0_i32_0 = arith.constant 0 : i32
    %c0_i32_1 = arith.constant 0 : i32
    return %c0_i32, %c0_i32_0 : i32, i32
  }
  func.func @transform_4(%arg0: i32) -> (i32, i32) {
    %c0_i32 = arith.constant 0 : i32
    %c0_i32_0 = arith.constant 0 : i32
    %c0_i32_1 = arith.constant 0 : i32
    return %c0_i32, %c0_i32_0 : i32, i32
  }
  func.func @transform_5(%arg0: i32) -> (i32, i32) {
    %c0_i32 = arith.constant 0 : i32
    %c0_i32_0 = arith.constant 0 : i32
    %c0_i32_1 = arith.constant 0 : i32
    return %c0_i32, %c0_i32_0 : i32, i32
  }
  func.func @transform_6(%arg0: i32) -> (i32, i32) {
    %c0_i32 = arith.constant 0 : i32
    %c0_i32_0 = arith.constant 0 : i32
    %c0_i32_1 = arith.constant 0 : i32
    return %c0_i32, %c0_i32_0 : i32, i32
  }
  func.func @transform_7(%arg0: i32) -> (i32, i32) {
    %c0_i32 = arith.constant 0 : i32
    %c0_i32_0 = arith.constant 0 : i32
    return %c0_i32, %arg0 : i32, i32
  }
}

</mosaic_0001>

<bundles_post_ra>
// kernel: tpu_custom_call.1
= control target key start
LH: loop header
LB: loop body
LE: loop exit
PB: predicated region body
PF: predicated region fallthrough
CT: control target
= control target key end

     0   :  { %s580_s0 = inlined_call_operand.vmem [shape: f32[8,32], index: 0, kind: input, shape index: {}]   ;;  %s581_s1 = inlined_call_operand.vmem [shape: f32[32,256], index: 1, kind: input, shape index: {}]   ;;  %s582_s2 = inlined_call_operand.vmem [shape: f32[1,256], index: 2, kind: input, shape index: {}]   ;;  %s583_s3 = inlined_call_operand.vmem [shape: f32[256,64], index: 3, kind: input, shape index: {}]   ;;  %s584_s4 = inlined_call_operand.vmem [shape: f32[1,64], index: 4, kind: input, shape index: {}]   ;;  %s585_s5 = inlined_call_operand.vmem [shape: f32[1,64], index: 5, kind: input, shape index: {}]   ;;  %s586_s6 = inlined_call_operand.<no memory space> [shape: f32[1,1], index: 6, kind: input, shape index: {}]   ;;  %s587_s7 = inlined_call_operand.hbm [shape: f32[1,8], index: 7, kind: output, shape index: {}]  }
   0x1   :  { %v12_v0 = vstv %s586_s6 }
   0x2   :  { %13 = vst [vmem:[#allocation2] sm:$0x1] %v12_v0 }
   0x3   :  { %v31_v1 = vld [vmem:[%s581_s1 + $0x8] sm:$0xff]  ;;  %v33_v2 = vld [vmem:[%s581_s1 + $0x18] sm:$0xff]  ;;  %v30_v3 = vld [vmem:[%s581_s1] sm:$0xff]  ;;  %v390_v8 = vmov 0.0   ;;  %vm50_vm0 = vcmask 261120  }
   0x4   :  { %v322_v4 = vpack.c.bf16 %v33_v2, %v31_v1  ;;  %v32_v5 = vld [vmem:[%s581_s1 + $0x10] sm:$0xff]  ;;  %v35_v6 = vld [vmem:[%s581_s1 + $0x28] sm:$0xff]  ;;  %v37_v7 = vld [vmem:[%s581_s1 + $0x38] sm:$0xff]  ;;  %118 = vmatprep.mubr.f32.mxu0 %v390_v8 }
   0x5   :  { %v324_v9 = vpack.c.bf16 %v32_v5, %v30_v3  ;;  %v326_v10 = vpack.c.bf16 %v37_v7, %v35_v6  ;;  %v34_v11 = vld [vmem:[%s581_s1 + $0x20] sm:$0xff]  ;;  %v36_v12 = vld [vmem:[%s581_s1 + $0x30] sm:$0xff]  ;;  %v144_v14 = vld [vmem:[%s583_s3 + $0x88] sm:$0xff] }
   0x6   :  { %323 = vmatprep.subr.bf16.mxu0 %v322_v4  ;;  %v143_v13 = vld [vmem:[%s583_s3 + $0x80] sm:$0xff]  ;;  %v328_v16 = vpack.c.bf16 %v36_v12, %v34_v11  ;;  %v128_v18 = vld [vmem:[%s583_s3 + $0x8] sm:$0xff]  ;;  %v145_v19 = vld [vmem:[%s583_s3 + $0x90] sm:$0xff] }
   0x7   :  { %v127_v15 = vld [vmem:[%s583_s3] sm:$0xff]  ;;  %325 = vmatpush1.bf16.msra.mxu0 %v324_v9  ;;  %v330_v17 = vpack.c.bf16 %v144_v14, %v143_v13  ;;  %v146_v20 = vld [vmem:[%s583_s3 + $0x98] sm:$0xff]  ;;  %v129_v23 = vld [vmem:[%s583_s3 + $0x10] sm:$0xff] }
   0x8   :  { %327 = vmatprep.subr.bf16.mxu0 %v326_v10  ;;  %v332_v21 = vpack.c.bf16 %v128_v18, %v127_v15  ;;  %v334_v22 = vpack.c.bf16 %v146_v20, %v145_v19  ;;  %v130_v24 = vld [vmem:[%s583_s3 + $0x18] sm:$0xff]  ;;  %v147_v25 = vld [vmem:[%s583_s3 + $0xa0] sm:$0xff]  ;;  %v148_v26 = vld [vmem:[%s583_s3 + $0xa8] sm:$0xff] }
   0x9   :  { %331 = vmatprep.subr.bf16.mxu1 %v330_v17  ;;  %v336_v27 = vpack.c.bf16 %v130_v24, %v129_v23  ;;  %v29_v28 = vld [vmem:[%s580_s0] sm:$0xff]  ;;  %v338_v29 = vpack.c.bf16 %v148_v26, %v147_v25  ;;  %v132_v31 = vld [vmem:[%s583_s3 + $0x28] sm:$0xff]  ;;  %v149_v32 = vld [vmem:[%s583_s3 + $0xb0] sm:$0xff] }
   0xa   :  { %333 = vmatpush3.bf16.msra.mxu1 %v332_v21  ;;  %v131_v30 = vld [vmem:[%s583_s3 + $0x20] sm:$0xff]  ;;  %v150_v33 = vld [vmem:[%s583_s3 + $0xb8] sm:$0xff]  ;;  %v133_v36 = vld [vmem:[%s583_s3 + $0x30] sm:$0xff] }
   0xb   :  { %329 = vmatpush1.bf16.msra.mxu0 %v328_v16  ;;  %335 = vmatprep.subr.bf16.mxu1 %v334_v22  ;;  %v340_v34 = vpack.c.bf16 %v132_v31, %v131_v30  ;;  %v342_v35 = vpack.c.bf16 %v150_v33, %v149_v32  ;;  %v134_v37 = vld [vmem:[%s583_s3 + $0x38] sm:$0xff] }
   0xe   :  { %284 = vmatmul.mubr.msk.f32.vlgmr.msra.gmra.mrb[0].mxu0 %vm50_vm0, %v29_v28  ;;  %337 = vmatpush3.bf16.msra.mxu1 %v336_v27 }
   0xf   :  { %339 = vmatprep.subr.bf16.mxu1 %v338_v29 }
  0x10   :  { %14 = vsyncpa [#allocation4], 0  ;;  %v151_v38 = vld [vmem:[%s583_s3 + $0xc0] sm:$0xff]  ;;  %v152_v39 = vld [vmem:[%s583_s3 + $0xc8] sm:$0xff]  ;;  %v344_v40 = vpack.c.bf16 %v134_v37, %v133_v36  ;;  %v40_v63 = vlaneseq  ;;  %v391_v12 = vmov 0   ;;  %vm245_vm1 = vcmask 523264  }
  0x11   :  { %v346_v41 = vpack.c.bf16 %v152_v39, %v151_v38  ;;  %v135_v42 = vld [vmem:[%s583_s3 + $0x40] sm:$0xff]  ;;  %v136_v43 = vld [vmem:[%s583_s3 + $0x48] sm:$0xff]  ;;  %v153_v44 = vld [vmem:[%s583_s3 + $0xd0] sm:$0xff]  ;;  %365 = vset.pattern.permute.xlu0 %v391_v12  ;;  %vm268_vm2 = vcmask 57344  }
  0x12   :  { %341 = vmatpush3.bf16.msra.mxu1 %v340_v34  ;;  %v154_v45 = vld [vmem:[%s583_s3 + $0xd8] sm:$0xff]  ;;  %v348_v46 = vpack.c.bf16 %v136_v43, %v135_v42  ;;  %v137_v48 = vld [vmem:[%s583_s3 + $0x50] sm:$0xff]  ;;  %v155_v50 = vld [vmem:[%s583_s3 + $0xe0] sm:$0xff]  ;;  %v41_v0 = vshrl.u32 %v40_v63, 7  ;;  %v262_v24 = vand.u32 127, %v40_v63 }
  0x13   :  { %343 = vmatprep.subr.bf16.mxu1 %v342_v35  ;;  %v350_v47 = vpack.c.bf16 %v154_v45, %v153_v44  ;;  %v138_v49 = vld [vmem:[%s583_s3 + $0x58] sm:$0xff]  ;;  %v156_v51 = vld [vmem:[%s583_s3 + $0xe8] sm:$0xff]  ;;  %v139_v54 = vld [vmem:[%s583_s3 + $0x60] sm:$0xff] }
  0x14   :  { %v352_v52 = vpack.c.bf16 %v138_v49, %v137_v48  ;;  %v354_v53 = vpack.c.bf16 %v156_v51, %v155_v50  ;;  %v140_v55 = vld [vmem:[%s583_s3 + $0x68] sm:$0xff]  ;;  %v157_v57 = vld [vmem:[%s583_s3 + $0xf0] sm:$0xff]  ;;  %v158_v58 = vld [vmem:[%s583_s3 + $0xf8] sm:$0xff]  ;;  %v42_v1 = vsub.s32 0, %v41_v0  ;;  %v46_v3 = vsub.s32 1, %v41_v0 }
  0x15   :  { %v356_v56 = vpack.c.bf16 %v140_v55, %v139_v54  ;;  %v358_v59 = vpack.c.bf16 %v158_v58, %v157_v57  ;;  %v141_v60 = vld [vmem:[%s583_s3 + $0x70] sm:$0xff]  ;;  %v142_v61 = vld [vmem:[%s583_s3 + $0x78] sm:$0xff]  ;;  %v38_v2 = vld [vmem:[%s582_s2] sm:$0x3]  ;;  %v265_v27 = vsub.s32 %v262_v24, %v41_v0 }
  0x16   :  { %345 = vmatpush3.bf16.msra.mxu1 %v344_v40  ;;  %v360_v62 = vpack.c.bf16 %v142_v61, %v141_v60  ;;  %v43_v4 = vrot.slane %v38_v2, %v42_v1  ;;  %v47_v5 = vrot.slane %v38_v2, %v46_v3  ;;  %v285_v14 = vld [vmem:[%s584_s4] ss:$0 sm:$0xff]  ;;  %s392_s4 = smov [#allocation3]  }
  0x17   :  { %347 = vmatprep.subr.bf16.mxu1 %v346_v41  ;;  %v286_v18 = vld [vmem:[%s585_s5] ss:$0 sm:$0xff]  ;;  %s276_s6 = sshll.u32 %s392_s4, 4  ;;  %s277_s6 = int_to_ptr.vmem [resolvable:$true] %s276_s6 }
  0x18   :  { %v249_v22 = vld [vmem:[#allocation2] sm:$0x1]  ;;  %s366_s5 = scalar_lea.vmem %s277_s6, 16  ;;  %s370_s12 = scalar_lea.vmem %s277_s6, 32 }
  0x19   :  { %p367_p0 = scmp.ne.s32.totalorder %s277_s6, %s366_s5  ;;  %p371_p1 = scmp.lt.s32.totalorder %s277_s6, %s277_s6 }
  0x1a   :  { %349 = vmatpush3.bf16.msra.mxu1 %v348_v46  ;;  %p372_p2 = scmp.lt.s32.totalorder %s370_s12, %s366_s5 }
  0x1b   :  { %351 = vmatprep.subr.bf16.mxu1 %v350_v47 }
  0x1c   :  { %p373_p3 = por %p372_p2, %p371_p1 }
  0x1e   :  { %353 = vmatpush3.bf16.msra.mxu1 %v352_v52  ;;  %p374_p4 = pnand %p373_p3, %p367_p0 }
  0x1f   :  { %355 = vmatprep.subr.bf16.mxu1 %v354_v53 }
  0x22   :  { %357 = vmatpush3.bf16.msra.mxu1 %v356_v56 }
  0x23   :  { %359 = vmatprep.subr.bf16.mxu1 %v358_v59 }
  0x26   :  { %361 = vmatpush3.bf16.msra.mxu1 %v360_v62 }
  0xe1   :  { %v120_v6 = vpop.f32.mrb[0].mxu0 }
  0xe2   :  { %v121_v7 = vadd.f32 %v120_v6, %v43_v4  ;;  %v122_v8 = vpop.f32.mrb[1].mxu0 }
  0xe3   :  { %v123_v9 = vadd.f32 %v122_v8, %v47_v5 }
  0xe4   :  { %v125_v11 = vmax.f32 %v121_v7, 0.0 }
  0xe5   :  { %v126_v10 = vmax.f32 %v123_v9, 0.0 }
  0xe7   :  { %230 = vmatprep.mubr.f32.mxu1 %v126_v10 }
  0xe8   :  { %231 = vmatmul.mubr.f32.vlgmr.msra.gmra.mrb[0].mxu1 %v125_v11 }
 0x1bb   :  { %v319_v13 = vpop.f32.mrb[0].mxu1 }
 0x1bc   :  { %v320_v15 = vpop.f32.mrb[1].mxu1 }
 0x1bd   :  { %v321_v16 = vadd.f32 %v320_v15, %v319_v13 }
 0x1bf   :  { %v233_v17 = vadd.f32 %v321_v16, %v285_v14 }
 0x1c1   :  { %v236_v19 = vmax.f32 %v233_v17, 0.0 }
 0x1c3   :  { %v244_v20 = vmul.f32 %v286_v18, %v236_v19 }
 0x1c5   :  { %v246_v21 = vsel %vm245_vm1, %v244_v20, 0.0 }
 0x1c6   :  { %247 = vadd.xlane.f32.xlu0 %v246_v21 }
 0x1dc   :  { %252 = vperm.xlu0 %365, %v249_v22  }
 0x253   :  { %v248_v23 = vpop.xlane.xlu0 %247 }
 0x25b   :  { %v253_v25 = vpop.permute.xlu0 %252 }
 0x25c   :  { %v258_v26 = vrot.slane %v253_v25, %v42_v1 }
 0x25e   :  { %v259_v28 = vadd.f32 %v258_v26, %v248_v23 }
 0x260   :  { %v266_v29 = vrot.slane %v259_v28, %v265_v27 }
 0x262   :  { %269 = vst.msk [vmem:[#allocation3] sm:$0x1] %vm268_vm2, %v266_v29 }
 0x263   :  { %377 = shalt.err (!%p374_p4)
}
 0x264   :  { %s378_s15 = scalar_lea.hbm %s587_s7, 16 }
 0x265   :  { %p379_p5 = scmp.ne.s32.totalorder %s587_s7, %s378_s15  ;;  %p382_p6 = scmp.lt.u32.totalorder %s378_s15, %s587_s7 }
 0x267   :  { %p384_p7 = pnand %p382_p6, %p379_p5 }
 0x269   :  { %387 = shalt.err (!%p384_p7)
}
 0x26a   :  { %279 = dma.vmem_to_hbm [thread:$0]  %s277_s6, 16, %s587_s7, [#allocation4]  }
 0x26b   :  { %388 = dma.done.wait [#allocation4], 16  }
 0x26c   :  { %389 = vsyncadd [#allocation4], 4294967280 }
 0x26d   :  { %283 = vsyncpa [#allocation4], 1 }

</bundles_post_ra>
